<compile_context>
chip_gen: v7x
topology: tpu7x:2x2x1
jax: 0.10.0
libtpu: 0.0.40
codegen_flags: <defaults>
</compile_context>

<pallas_src>
import functools

import jax
import jax.numpy as jnp
from jax import lax
from jax.experimental import pallas as pl
from jax.experimental.pallas import tpu as pltpu

_EPS = 1e-5  # nn.InstanceNorm2d default eps, affine=False


def _round_up(v, m):
    return -(-v // m) * m


def _down2d_kernel(p_ref, w_ref, b_ref, sel_ref, bsel_ref, o_ref, *, nb, sp, s, cp):
    # p_ref:    (Kp, NB*Sp)   dot dtype — patch slab for NB samples, spatial on lanes
    # w_ref:    (2*Cp, Kp)    dot dtype — [conv1 ; conv2] stacked on rows
    # b_ref:    (2*Cp, 1)     f32
    # sel_ref:  (NB*Sp, NB)   f32 — per-sample column selector, 0 at padded lanes
    # bsel_ref: (NB, NB*Sp)   f32 — per-sample broadcast-back selector
    # o_ref:    (Cp, NB*Sp)   out dtype — lane-dense gated output
    inv_s = 1.0 / s

    # One lane-dense MXU matmul covers both convs and all NB samples of this step.
    acc = jnp.dot(w_ref[...], p_ref[...], preferred_element_type=jnp.float32)
    acc = acc + b_ref[...]                                    # (2Cp, NB*Sp) f32

    if nb == 1:
        # Per-sample stats == per-block stats: plain masked lane reductions.
        pos = lax.broadcasted_iota(jnp.int32, (1, sp), 1)
        valid = pos < s
        mean = jnp.sum(jnp.where(valid, acc, 0.0), axis=1, keepdims=True) * inv_s
        centered = acc - mean
        var = jnp.sum(jnp.where(valid, centered * centered, 0.0),
                      axis=1, keepdims=True) * inv_s          # two-pass variance
        norm = centered * lax.rsqrt(var + _EPS)
    else:
        # Per-sample stats via selector matmuls (MXU): no in-kernel reshape or
        # relayout; sel zeroes the padded spatial lanes out of the sums.
        sel = sel_ref[...]
        bsel = bsel_ref[...]
        mean = jnp.dot(acc, sel, preferred_element_type=jnp.float32) * inv_s      # (2Cp, NB)
        centered = acc - jnp.dot(mean, bsel, preferred_element_type=jnp.float32)
        var = jnp.dot(centered * centered, sel,
                      preferred_element_type=jnp.float32) * inv_s                  # two-pass
        inv_std = lax.rsqrt(var + _EPS)                                            # (2Cp, NB)
        norm = centered * jnp.dot(inv_std, bsel, preferred_element_type=jnp.float32)

    x1 = norm[:cp]   # conv1 branch; cp is a multiple of 8 -> sublane-aligned split
    x2 = norm[cp:]   # conv2 branch
    o_ref[...] = (x1 * jax.nn.sigmoid(x2)).astype(o_ref.dtype)


def _im2col(x, kh, kw, stride, padding):
    """NCHW -> patches (N, Cin*kh*kw, OH*OW); K ordered (Cin, kh, kw) to match
    PyTorch's weight.reshape(Cout, Cin*kh*kw). Spatial stays last (lanes)."""
    n, c, h, w = x.shape
    xp = jnp.pad(x, ((0, 0), (0, 0), (padding, padding), (padding, padding)))
    oh = (h + 2 * padding - kh) // stride + 1
    ow = (w + 2 * padding - kw) // stride + 1
    cols = []
    for i in range(kh):
        for j in range(kw):
            cols.append(xp[:, :, i:i + stride * oh:stride, j:j + stride * ow:stride])
    p = jnp.stack(cols, axis=2)                  # (N, C, kh*kw, OH, OW)
    p = p.reshape(n, c * kh * kw, oh * ow)       # (N, K, S)
    return p, oh, ow


def _choose_nb(n, kp, sp, cp, in_bytes, out_bytes):
    """Samples per grid step: sized by bytes under a per-generation VMEM budget."""
    patch_bytes = kp * sp * in_bytes                       # one sample's patch slab
    out_bytes_s = cp * sp * out_bytes
    f32_tmps = 4 * (2 * cp) * sp * 4                       # acc/centered/norm/gate f32 temps
    per_sample = 2 * patch_bytes + 2 * out_bytes_s + f32_tmps   # 2x: double-buffered blocks
    vmem_budget = 40 * 1024 * 1024                         # headroom under v7x's 64 MiB physical
    nb_vmem = max(1, vmem_budget // max(per_sample, 1))
    nb_bw = max(1, (512 * 1024) // max(patch_bytes, 1))    # >= ~0.5 MiB of patch DMA per step
    nb = int(min(nb_vmem, nb_bw))
    if n >= 2:
        nb = min(nb, -(-n // 2))   # keep >= 2 grid steps so "parallel" can use both v7x TCs
    return max(1, min(nb, n))


def down2d(x, w1, b1, w2, b2, stride, padding, *,
           dot_dtype=jnp.bfloat16, out_dtype=jnp.bfloat16):
    n, cin, h, w = x.shape
    cout, _, kh, kw = w1.shape

    patches, oh, ow = _im2col(x, kh, kw, stride, padding)   # (N, K, S)
    k = cin * kh * kw
    s = oh * ow

    # Static padding for TPU-friendly tiles.
    kp = _round_up(k, 16)     # bf16 sublane pack on the contraction dim
    sp = _round_up(s, 128)    # per-sample spatial slot width = lane-tile multiple
    cp = _round_up(cout, 8)   # f32 sublane tile so the conv1/conv2 split stays aligned

    nb = _choose_nb(n, kp, sp, cp,
                    jnp.dtype(dot_dtype).itemsize, jnp.dtype(out_dtype).itemsize)
    n_pad = _round_up(n, nb)
    nblk = n_pad // nb

    patches = jnp.pad(patches, ((0, n_pad - n), (0, kp - k), (0, sp - s))).astype(dot_dtype)
    # (N_pad, Kp, Sp) -> (NBLK, Kp, NB*Sp): the NB samples of one grid step are
    # folded into the lane axis (sample-major), giving one lane-dense dot/store.
    patches = patches.reshape(nblk, nb, kp, sp).transpose(0, 2, 1, 3).reshape(nblk, kp, nb * sp)

    def _wmat(wc):
        m = wc.reshape(cout, k)
        return jnp.pad(m, ((0, cp - cout), (0, kp - k)))

    w_mat = jnp.concatenate([_wmat(w1), _wmat(w2)], axis=0).astype(dot_dtype)      # (2Cp, Kp)
    b_vec = jnp.concatenate([jnp.pad(b1, (0, cp - cout)),
                             jnp.pad(b2, (0, cp - cout))]).astype(jnp.float32)[:, None]

    # Per-sample selectors (tiny, grid-invariant, single-buffered).
    lane = jnp.arange(nb * sp)
    samp = lane // sp
    sel = ((samp[:, None] == jnp.arange(nb)[None, :]) &
           ((lane % sp)[:, None] < s)).astype(jnp.float32)       # (NB*Sp, NB)
    bsel = (samp[None, :] == jnp.arange(nb)[:, None]).astype(jnp.float32)  # (NB, NB*Sp)

    kernel = functools.partial(_down2d_kernel, nb=nb, sp=sp, s=s, cp=cp)
    const_buf = pl.Buffered(1)   # grid-invariant operands: no second VMEM buffer / refetch

    out = pl.pallas_call(
        kernel,
        out_shape=jax.ShapeDtypeStruct((nblk, cp, nb * sp), out_dtype),
        grid_spec=pltpu.PrefetchScalarGridSpec(
            num_scalar_prefetch=0,
            grid=(nblk,),
            in_specs=[
                pl.BlockSpec((None, kp, nb * sp), lambda i: (i, 0, 0)),
                pl.BlockSpec((2 * cp, kp), lambda i: (0, 0), pipeline_mode=const_buf),
                pl.BlockSpec((2 * cp, 1), lambda i: (0, 0), pipeline_mode=const_buf),
                pl.BlockSpec((nb * sp, nb), lambda i: (0, 0), pipeline_mode=const_buf),
                pl.BlockSpec((nb, nb * sp), lambda i: (0, 0), pipeline_mode=const_buf),
            ],
            out_specs=pl.BlockSpec((None, cp, nb * sp), lambda i: (i, 0, 0)),
        ),
        compiler_params=pltpu.CompilerParams(
            # Sample blocks are independent -> shard grid steps across v7x's 2 TCs.
            dimension_semantics=("parallel",),
            # Explicit scoped-VMEM limit: above v5e/v6e defaults (16/32 MiB),
            # below v7x's 64 MiB physical, and above the 40 MiB block budget.
            vmem_limit_bytes=48 * 1024 * 1024,
        ),
    )(patches, w_mat, b_vec, sel, bsel)

    # (NBLK, Cp, NB*Sp) -> (N, Cout, OH, OW)
    out = out.reshape(nblk, cp, nb, sp).transpose(0, 2, 1, 3).reshape(n_pad, cp, sp)
    return out[:n, :cout, :s].reshape(n, cout, oh, ow)


def down2d_ref(x, w1, b1, w2, b2, stride, padding):
    """Pure-JAX reference matching PyTorch semantics (f32 throughout)."""
    def conv(xx, ww, bb):
        y = lax.conv_general_dilated(
            xx, ww, (stride, stride),
            [(padding, padding), (padding, padding)],
            dimension_numbers=("NCHW", "OIHW", "NCHW"))
        return y + bb[None, :, None, None]

    def inorm(y):
        mean = y.mean(axis=(2, 3), keepdims=True)
        var = jnp.square(y - mean).mean(axis=(2, 3), keepdims=True)
        return (y - mean) / jnp.sqrt(var + _EPS)

    x1 = inorm(conv(x, w1, b1))
    x2 = inorm(conv(x, w2, b2))
    return x1 * jax.nn.sigmoid(x2)


if __name__ == "__main__":
    # Down2d(in_channel=4, out_channel=8, kernel=3, stride=2, padding=1)
    N, CIN, COUT, H, W = 2, 4, 8, 16, 16
    KH = KW = 3
    STRIDE, PADDING = 2, 1

    key = jax.random.PRNGKey(0)
    kx, kw1, kb1, kw2, kb2 = jax.random.split(key, 5)
    x = jax.random.normal(kx, (N, CIN, H, W), jnp.float32)
    w1 = 0.1 * jax.random.normal(kw1, (COUT, CIN, KH, KW), jnp.float32)
    b1 = 0.1 * jax.random.normal(kb1, (COUT,), jnp.float32)
    w2 = 0.1 * jax.random.normal(kw2, (COUT, CIN, KH, KW), jnp.float32)
    b2 = 0.1 * jax.random.normal(kb2, (COUT,), jnp.float32)

    ref = down2d_ref(x, w1, b1, w2, b2, STRIDE, PADDING)

    # Default (perf) path: bf16 matmul operands + bf16 output, f32 stats/norm.
    out_bf16 = jax.block_until_ready(down2d(x, w1, b1, w2, b2, STRIDE, PADDING))
    assert out_bf16.shape == ref.shape == (N, COUT, H // STRIDE, W // STRIDE)
    assert jnp.allclose(out_bf16.astype(jnp.float32), ref, atol=5e-2, rtol=5e-2), \
        "bf16 path mismatch vs JAX reference"

    # Full-f32 path: exact forward-pass semantics check (two-pass variance).
    out_f32 = jax.block_until_ready(
        down2d(x, w1, b1, w2, b2, STRIDE, PADDING,
               dot_dtype=jnp.float32, out_dtype=jnp.float32))
    assert jnp.allclose(out_f32, ref, atol=1e-4, rtol=1e-4), \
        "f32 path mismatch vs JAX reference"

    # Larger odd batch: exercises the multi-sample-per-step (selector) path plus
    # batch / spatial / channel padding.
    N2 = 5
    x5 = jax.random.normal(jax.random.PRNGKey(1), (N2, CIN, H, W), jnp.float32)
    ref5 = down2d_ref(x5, w1, b1, w2, b2, STRIDE, PADDING)
    out5 = jax.block_until_ready(down2d(x5, w1, b1, w2, b2, STRIDE, PADDING))
    assert out5.shape == ref5.shape
    assert jnp.allclose(out5.astype(jnp.float32), ref5, atol=5e-2, rtol=5e-2), \
        "multi-sample-per-step path mismatch vs JAX reference"

    print("KERNEL_OK")
</pallas_src>

<mosaic_0001>
module attributes {stable_mosaic.version = 11 : i64} {
  func.func @_down2d_kernel(%arg0: i32, %arg1: memref<1x48x128xbf16, #tpu.memory_space<vmem>>, %arg2: memref<16x48xbf16, #tpu.memory_space<vmem>>, %arg3: memref<16x1xf32, #tpu.memory_space<vmem>>, %arg4: memref<128x1xf32, #tpu.memory_space<vmem>>, %arg5: memref<1x128xf32, #tpu.memory_space<vmem>>, %arg6: memref<1x8x128xbf16, #tpu.memory_space<vmem>>) attributes {dimension_semantics = [#tpu.dimension_semantics<parallel>], iteration_bounds = array<i64: 2>, scalar_prefetch = 0 : i64, scratch_operands = 0 : i64, tpu.core_type = #tpu.core_type<tc>, window_params = [{transform_indices = @transform_0, window_bounds = array<i64: 1, 48, 128>}, {pipeline_mode = #tpu.pipeline_mode<synchronous>, transform_indices = @transform_1, window_bounds = array<i64: 16, 48>}, {pipeline_mode = #tpu.pipeline_mode<synchronous>, transform_indices = @transform_2, window_bounds = array<i64: 16, 1>}, {pipeline_mode = #tpu.pipeline_mode<synchronous>, transform_indices = @transform_3, window_bounds = array<i64: 128, 1>}, {pipeline_mode = #tpu.pipeline_mode<synchronous>, transform_indices = @transform_4, window_bounds = array<i64: 1, 128>}, {transform_indices = @transform_5, window_bounds = array<i64: 1, 8, 128>}]} {
    %c0 = arith.constant 0 : index
    %c0_0 = arith.constant 0 : index
    %0 = vector.load %arg2[%c0, %c0_0] : memref<16x48xbf16, #tpu.memory_space<vmem>>, vector<16x48xbf16>
    %c0_1 = arith.constant 0 : index
    %c0_2 = arith.constant 0 : index
    %c0_3 = arith.constant 0 : index
    %1 = vector.load %arg1[%c0_1, %c0_2, %c0_3] : memref<1x48x128xbf16, #tpu.memory_space<vmem>>, vector<1x48x128xbf16>
    %2 = vector.shape_cast %1 : vector<1x48x128xbf16> to vector<48x128xbf16>
    %cst = arith.constant dense<0.000000e+00> : vector<16x128xf32>
    %3 = tpu.matmul %0, %2, %cst {dimension_numbers = #tpu.dot_dimension_numbers<[1], [0], [0], [1], [0, 0, 1, 1], [], []>} : vector<16x48xbf16>, vector<48x128xbf16>, vector<16x128xf32> -> vector<16x128xf32>
    %c0_4 = arith.constant 0 : index
    %c0_5 = arith.constant 0 : index
    %4 = vector.load %arg3[%c0_4, %c0_5] : memref<16x1xf32, #tpu.memory_space<vmem>>, vector<16x1xf32>
    %5 = vector.broadcast %4 : vector<16x1xf32> to vector<16x128xf32>
    %6 = arith.addf %3, %5 : vector<16x128xf32>
    %7 = tpu.iota {dimensions = array<i32: 1>} : vector<1x128xi32>
    %c64_i32 = arith.constant 64 : i32
    %8 = vector.broadcast %c64_i32 : i32 to vector<1x128xi32>
    %9 = arith.cmpi slt, %7, %8 : vector<1x128xi32>
    %cst_6 = arith.constant 0.000000e+00 : f32
    %10 = vector.shape_cast %9 : vector<1x128xi1> to vector<1x128xi1>
    %11 = vector.broadcast %10 : vector<1x128xi1> to vector<16x128xi1>
    %12 = vector.broadcast %cst_6 : f32 to vector<16x128xf32>
    %13 = arith.select %11, %6, %12 : vector<16x128xi1>, vector<16x128xf32>
    %cst_7 = arith.constant dense<0.000000e+00> : vector<16xf32>
    %14 = vector.multi_reduction <add>, %13, %cst_7 [1] : vector<16x128xf32> to vector<16xf32>
    %15 = vector.shape_cast %14 : vector<16xf32> to vector<16x1xf32>
    %cst_8 = arith.constant 1.562500e-02 : f32
    %16 = vector.broadcast %cst_8 : f32 to vector<16x1xf32>
    %17 = arith.mulf %15, %16 : vector<16x1xf32>
    %18 = vector.broadcast %17 : vector<16x1xf32> to vector<16x128xf32>
    %19 = arith.subf %6, %18 : vector<16x128xf32>
    %20 = arith.mulf %19, %19 : vector<16x128xf32>
    %cst_9 = arith.constant 0.000000e+00 : f32
    %21 = vector.shape_cast %9 : vector<1x128xi1> to vector<1x128xi1>
    %22 = vector.broadcast %21 : vector<1x128xi1> to vector<16x128xi1>
    %23 = vector.broadcast %cst_9 : f32 to vector<16x128xf32>
    %24 = arith.select %22, %20, %23 : vector<16x128xi1>, vector<16x128xf32>
    %cst_10 = arith.constant dense<0.000000e+00> : vector<16xf32>
    %25 = vector.multi_reduction <add>, %24, %cst_10 [1] : vector<16x128xf32> to vector<16xf32>
    %26 = vector.shape_cast %25 : vector<16xf32> to vector<16x1xf32>
    %cst_11 = arith.constant 1.562500e-02 : f32
    %27 = vector.broadcast %cst_11 : f32 to vector<16x1xf32>
    %28 = arith.mulf %26, %27 : vector<16x1xf32>
    %cst_12 = arith.constant 9.99999974E-6 : f32
    %29 = vector.broadcast %cst_12 : f32 to vector<16x1xf32>
    %30 = arith.addf %28, %29 : vector<16x1xf32>
    %31 = math.rsqrt %30 : vector<16x1xf32>
    %32 = vector.broadcast %31 : vector<16x1xf32> to vector<16x128xf32>
    %33 = arith.mulf %19, %32 : vector<16x128xf32>
    %34 = vector.extract_strided_slice %33 {offsets = [0, 0], sizes = [8, 128], strides = [1, 1]} : vector<16x128xf32> to vector<8x128xf32>
    %35 = vector.extract_strided_slice %33 {offsets = [8, 0], sizes = [8, 128], strides = [1, 1]} : vector<16x128xf32> to vector<8x128xf32>
    %36 = arith.negf %35 : vector<8x128xf32>
    %37 = math.exp %36 : vector<8x128xf32>
    %cst_13 = arith.constant 1.000000e+00 : f32
    %38 = vector.broadcast %cst_13 : f32 to vector<8x128xf32>
    %39 = arith.addf %38, %37 : vector<8x128xf32>
    %40 = arith.divf %38, %39 : vector<8x128xf32>
    %41 = arith.mulf %34, %40 : vector<8x128xf32>
    %42 = arith.truncf %41 : vector<8x128xf32> to vector<8x128xbf16>
    %c0_14 = arith.constant 0 : index
    %c0_15 = arith.constant 0 : index
    %c0_16 = arith.constant 0 : index
    %43 = vector.load %arg6[%c0_14, %c0_15, %c0_16] : memref<1x8x128xbf16, #tpu.memory_space<vmem>>, vector<1x8x128xbf16>
    %44 = vector.shape_cast %43 : vector<1x8x128xbf16> to vector<8x128xbf16>
    %45 = vector.shape_cast %42 : vector<8x128xbf16> to vector<1x8x128xbf16>
    tpu.vector_store %arg6[%c0_14, %c0_15, %c0_16], %45 {strides = array<i32>} : memref<1x8x128xbf16, #tpu.memory_space<vmem>>, vector<1x8x128xbf16>,
    return
  }
  func.func @transform_0(%arg0: i32) -> (i32, i32, i32) {
    %c0_i32 = arith.constant 0 : i32
    %c0_i32_0 = arith.constant 0 : i32
    %c0_i32_1 = arith.constant 0 : i32
    return %arg0, %c0_i32, %c0_i32_0 : i32, i32, i32
  }
  func.func @transform_1(%arg0: i32) -> (i32, i32) {
    %c0_i32 = arith.constant 0 : i32
    %c0_i32_0 = arith.constant 0 : i32
    %c0_i32_1 = arith.constant 0 : i32
    return %c0_i32, %c0_i32_0 : i32, i32
  }
  func.func @transform_2(%arg0: i32) -> (i32, i32) {
    %c0_i32 = arith.constant 0 : i32
    %c0_i32_0 = arith.constant 0 : i32
    %c0_i32_1 = arith.constant 0 : i32
    return %c0_i32, %c0_i32_0 : i32, i32
  }
  func.func @transform_3(%arg0: i32) -> (i32, i32) {
    %c0_i32 = arith.constant 0 : i32
    %c0_i32_0 = arith.constant 0 : i32
    %c0_i32_1 = arith.constant 0 : i32
    return %c0_i32, %c0_i32_0 : i32, i32
  }
  func.func @transform_4(%arg0: i32) -> (i32, i32) {
    %c0_i32 = arith.constant 0 : i32
    %c0_i32_0 = arith.constant 0 : i32
    %c0_i32_1 = arith.constant 0 : i32
    return %c0_i32, %c0_i32_0 : i32, i32
  }
  func.func @transform_5(%arg0: i32) -> (i32, i32, i32) {
    %c0_i32 = arith.constant 0 : i32
    %c0_i32_0 = arith.constant 0 : i32
    %c0_i32_1 = arith.constant 0 : i32
    return %arg0, %c0_i32, %c0_i32_0 : i32, i32, i32
  }
}

</mosaic_0001>

<bundles_post_ra>
// kernel: tpu_custom_call.1
= control target key start
LH: loop header
LB: loop body
LE: loop exit
PB: predicated region body
PF: predicated region fallthrough
CT: control target
= control target key end

     0   :  { %10 = vsyncpa [#allocation3], 0  ;;  %s722_s0 = inlined_call_operand.vmem [shape: bf16[2,48,128], index: 0, kind: input, shape index: {}]   ;;  %s723_s1 = inlined_call_operand.vmem [shape: bf16[16,48], index: 1, kind: input, shape index: {}]   ;;  %s724_s2 = inlined_call_operand.vmem [shape: f32[16,1], index: 2, kind: input, shape index: {}]   ;;  %s725_s3 = inlined_call_operand.vmem [shape: f32[128,1], index: 3, kind: input, shape index: {}]   ;;  %s726_s4 = inlined_call_operand.vmem [shape: f32[1,128], index: 4, kind: input, shape index: {}]   ;;  %s727_s5 = inlined_call_operand.hbm [shape: bf16[2,8,128], index: 5, kind: output, shape index: {}]  }
   0x1   :  { %12 = vsyncpa [#allocation3 + $0x1], 0  ;;  %s609_s18 = smov 0   ;;  %s611_s19 = smov 0  }
   0x2   :  { %s613_s20 = smov 0   ;;  %s615_s21 = smov 0  }
   0x3 LB: > { %s630_s3 = sadd.s32 4294967295, %s573_s21   ;;  %s425_s4 = sadd.s32 4294967294, %s573_s21   ;;  %s573_s21 = sphi %s615_s21, %s733_s21   ;;  %s569_s20 = sphi %s613_s20, %s732_s20   ;;  %s565_s19 = sphi %s611_s19, %s731_s19   ;;  %s561_s18 = sphi %s609_s18, %s730_s18  }
   0x4   : > { %s634_s22 = sadd.s32 1, %s573_s21   ;;  %s135_s23 = sadd.s32 1, %s569_s20 }
   0x5   : > { %s132_s24 = ssub.s32 %s573_s21, %s634_s22  ;;  %p145_p0 = scmp.ne.s32.totalorder %s569_s20, %s565_s19 }
   0x6   : > { %p133_p1 = scmp.eq.s32.totalorder %s132_s24, 0  ;;  %p146_p2 = scmp.eq.s32.totalorder %s630_s3, 1 }
   0x7   : > { %p151_p3 = scmp.ne.s32.totalorder %s565_s19, %s561_s18  ;;  %p152_p4 = scmp.eq.s32.totalorder %s425_s4, 1 }
   0x8   : > { %s645_s25 = scalar_select %p133_p1, %s569_s20, %s135_s23  }
   0x9   : > { %p647_p5 = por %p146_p2, %p145_p0  ;;  %p651_p6 = por %p152_p4, %p151_p3 }
   0xa   : > { %p428_p7 = scmp.ge.s32.totalorder %s573_s21, 1  ;;  %p190_p8 = scmp.lt.s32.totalorder %s573_s21, 3 }
   0xc   : > { %p191_p9 = pnand %p428_p7, %p190_p8 }
   0xd   : > { %p218_p10 = scmp.lt.s32.totalorder (!%p191_p9), %s630_s3, 1  ;;  %v575_v0 = vmov (!%p191_p9), 0.0   ;;  %vm576_vm0 = vmmov (!%p191_p9), 0   ;;  %v233_v1 = vld [vmem:[%s724_s2 + $0x8] sm:$0xff] (!%p191_p9)  ;;  %v577_v2 = vmov (!%p191_p9), 0   ;;  %v232_v3 = vld [vmem:[%s724_s2] sm:$0xff] (!%p191_p9)  ;;  %v312_v9 = vlaneseq (!%p191_p9) }
   0xe   : > { %194 = sbr.rel (%p191_p9) target bundleno = 607 (0x25f), region = 40  ;;  %445 = vmatprep.subr.bf16.mxu0 (!%p191_p9), %v575_v0  ;;  %451 = vmatprep.mubr.msk.bf16.mxu0 (!%p191_p9), %vm576_vm0, %v575_v0  ;;  %v502_v7 = vld [vmem:[%s723_s1] sm:$0xff] (!%p191_p9)   ;;  %vm267_vm1 = vcmask (!%p191_p9), 392192   ;;  %s215_s14 = sand.u32 (!%p191_p9), 1, %s565_s19  }
   0xf   : > { %498 = vset.pattern.permute.xlu0 (!%p191_p9), %v577_v2  ;;  %v313_v11 = vand.u32 (!%p191_p9), 127, %v312_v9  ;;  %s429_s15 = sshll.u32 (!%p191_p9), %s215_s14, 2  ;;  %s438_s16 = sshll.u32 (!%p191_p9), %s630_s3, 6 }
  0x10   : > { %241 = vperm.xlu0 (!%p191_p9), %498, %v233_v1   ;;  %s217_s17 = scalar_lea.vmem (!%p191_p9), [#allocation2], %s429_s15  ;;  %s680_s28 = scalar_lea.hbm (!%p191_p9), %s727_s5, %s438_s16 }
  0x11   : > { %vm314_vm2 = vcmp.lt.s32.totalorder (!%p191_p9), %v313_v11, 64  ;;  %s366_s4 = sshll.u32 (!%p191_p9), %s217_s17, 4  ;;  %s353_s29 = scalar_lea.sflag (!%p191_p9), [#allocation3], %s215_s14  ;;  %s682_s4 = int_to_ptr.vmem [resolvable:$true] %s366_s4 }
  0x14   : > { %236 = vperm.xlu0 (!%p191_p9), %498, %v232_v3  }
  0x15   : > { %s219_s30 = scalar_select %p218_p10, %s630_s3, 1 }
  0x16   : > { %s578_s3 = smov [#allocation2]  }
  0x17   : > { %s455_s6 = smul.u32 24, %s219_s30  ;;  %s511_s30 = scalar_lea.vmem %s682_s4, 64 }
  0x18   : > { %p512_p11 = scmp.ne.s32.totalorder %s682_s4, %s511_s30 }
  0x19   : > { %s222_s11 = scalar_lea.vmem %s722_s0, %s455_s6  ;;  %s515_s6 = sshll.u32 %s578_s3, 4  ;;  %s516_s6 = int_to_ptr.vmem [resolvable:$false] %s515_s6 }
  0x1a   : > { %v499_v4 = vld [vmem:[%s222_s11] sm:$0xff]   ;;  %v500_v5 = vld [vmem:[%s222_s11 + $0x8] sm:$0xff]   ;;  %v501_v6 = vld [vmem:[%s222_s11 + $0x10] sm:$0xff]   ;;  %p513_p12 = pnand %p512_p11, %p647_p5  ;;  %s517_s7 = scalar_lea.vmem %s516_s6, 128 }
  0x1b   : > { %446 = vmatpush3.bf16.msra.mxu0 %v499_v4  ;;  %p518_p0 = scmp.lt.s32.totalorder %s682_s4, %s516_s6  ;;  %p519_p1 = scmp.lt.s32.totalorder %s517_s7, %s511_s30 }
  0x1c   : > { %447 = vmatprep.subr.bf16.mxu0 %v575_v0  ;;  %p514_p13 = pneg %p513_p12 }
  0x1d   : > { %p520_p2 = por %p519_p1, %p518_p0 }
  0x1f   : > { %448 = vmatpush3.bf16.msra.mxu0 %v500_v5  ;;  %p521_p3 = pnand %p520_p2, %p514_p13 }
  0x20   : > { %449 = vmatprep.subr.bf16.mxu0 %v575_v0 }
  0x23   : > { %450 = vmatpush3.bf16.msra.mxu0 %v501_v6 }
  0x26   : > { %452 = vmatmul.mubr.msk.bf16.vlgmr.msra.gmra.mrb[0].mxu0 %vm267_vm1, %v502_v7 }
  0x8f   : > { %v242_v8 = vpop.permute.xlu0 %241 }
  0x93   : > { %v237_v13 = vpop.permute.xlu0 %236 }
  0xf9   : > { %v305_v10 = vpop.f32.mrb[0].mxu0 }
  0xfa   : > { %v453_v12 = vpop.f32.mrb[1].mxu0  ;;  %v306_v17 = vadd.f32 %v305_v10, %v237_v13 }
  0xfb   : > { %v308_v14 = vpop.f32.mrb[2].mxu0 }
  0xfc   : > { %v309_v15 = vadd.f32 %v308_v14, %v242_v8  ;;  %v454_v16 = vpop.f32.mrb[3].mxu0  ;;  %v317_v19 = vsel %vm314_vm2, %v306_v17, 0.0 }
  0xfe   : > { %v318_v18 = vsel %vm314_vm2, %v309_v15, 0.0 }
  0xff   : > { %321 = vadd.xlane.f32.xlu1 %v318_v18 }
 0x103   : > { %319 = vadd.xlane.f32.xlu1 %v317_v19 }
 0x18c   : > { %v322_v20 = vpop.xlane.xlu1 %321 }
 0x18d   : > { %v324_v21 = vmul.f32 0.015625, %v322_v20 }
 0x18f   : > { %v326_v22 = vsub.f32 %v309_v15, %v324_v21 }
 0x190   : > { %v320_v23 = vpop.xlane.xlu1 %319 }
 0x191   : > { %v323_v24 = vmul.f32 0.015625, %v320_v23  ;;  %v328_v25 = vmul.f32 %v326_v22, %v326_v22 }
 0x193   : > { %v325_v26 = vsub.f32 %v306_v17, %v323_v24  ;;  %v330_v27 = vsel %vm314_vm2, %v328_v25, 0.0 }
 0x194   : > { %333 = vadd.xlane.f32.xlu0 %v330_v27 }
 0x195   : > { %v327_v28 = vmul.f32 %v325_v26, %v325_v26 }
 0x197   : > { %v329_v29 = vsel %vm314_vm2, %v327_v28, 0.0 }
 0x198   : > { %331 = vadd.xlane.f32.xlu1 %v329_v29 }
 0x221   : > { %v334_v30 = vpop.xlane.xlu0 %333 }
 0x222   : > { %v336_v31 = vmul.f32 0.015625, %v334_v30 }
 0x224   : > { %v338_v32 = vadd.f32 1e-05, %v336_v31 }
 0x225   : > { %v332_v36 = vpop.xlane.xlu1 %331 }
 0x226   : > { %503 = vrsqrt.f32 %v338_v32  ;;  %v335_v37 = vmul.f32 0.015625, %v332_v36 }
 0x228   : > { %v337_v38 = vadd.f32 1e-05, %v335_v37 }
 0x230   : > { %v504_v33 = vpop.eup %503 }
 0x231   : > { %v342_v34 = vmul.f32 %v504_v33, %v326_v22 }
 0x233   : > { %v436_v35 = vmul.f32 -1.442695, %v342_v34 }
 0x235   : > { %505 = vpow2.f32 %v436_v35 }
 0x236   : > { %507 = vrsqrt.f32 %v337_v38 }
 0x23f   : > { %v506_v39 = vpop.eup %505 }
 0x240   : > { %v346_v40 = vadd.f32 1.0, %v506_v39  ;;  %v508_v41 = vpop.eup %507 }
 0x241   : > { %v341_v42 = vmul.f32 %v508_v41, %v325_v26 }
 0x242   : > { %509 = vrcp.f32 %v346_v40 }
 0x24c   : > { %v510_v43 = vpop.eup %509 }
 0x24d   : > { %v349_v44 = vmul.f32 %v510_v43, %v341_v42 }
 0x24f   : > { %v350_v45 = vpack.c.bf16 %v349_v44, %v349_v44 }
 0x251   : > { %351 = vst [vmem:[%s217_s17] sm:$0xf] %v350_v45 }
 0x252   : > { %524 = shalt.err (!%p521_p3)
}
 0x253   : > { %s525_s8 = scalar_lea.hbm %s680_s28, 64  ;;  %s529_s11 = scalar_lea.hbm %s727_s5, 128 }
 0x254   : > { %p526_p4 = scmp.ne.s32.totalorder %s680_s28, %s525_s8  ;;  %p530_p9 = scmp.lt.u32.totalorder %s680_s28, %s727_s5 }
 0x255   : > { %p531_p10 = scmp.lt.u32.totalorder %s529_s11, %s525_s8  ;;  %p533_p12 = scmp.lt.u32.totalorder %s525_s8, %s680_s28 }
 0x256   : > { %p527_p7 = pnand %p526_p4, %p647_p5 }
 0x257   : > { %p532_p11 = por %p531_p10, %p530_p9 }
 0x258   : > { %p528_p8 = pneg %p527_p7 }
 0x259   : > { %p534_p13 = por %p533_p12, %p532_p11 }
 0x25b   : > { %p535_p0 = pnand %p534_p13, %p528_p8 }
 0x25d   : > { %538 = shalt.err (!%p535_p0)
}
 0x25e   : > { %456 = dma.vmem_to_hbm [thread:$0]  (%p647_p5), %s682_s4, 64, %s680_s28, %s353_s29  }
 0x25f PF: > { %p462_p1 = scmp.ge.s32.totalorder %s573_s21, 2  ;;  %s378_s14 = sand.u32 1, %s561_s18  }
 0x260   : > { %s379_s15 = scalar_lea.sflag [#allocation3], %s378_s14 }
 0x261   : > { %p459_p2 = pnand %p462_p1, %p651_p6 }
 0x263   : > { %556 = dma.done.wait (!%p459_p2), %s379_s15, 64  }
 0x264   : > { %558 = vsyncadd (!%p459_p2), %s379_s15, 4294967232  ;;  %p15_p3 = scmp.ge.s32.totalorder %s634_s22, 4   ;;  %s730_s18 = smov %s565_s19 }
 0x265   : > { %s731_s19 = smov %s569_s20  ;;  %s732_s20 = smov %s645_s25 }
 0x266   : > { %s733_s21 = smov %s634_s22  ;;  %17 = sbr.rel (!%p15_p3) target bundleno = 3 (0x3), region = 75 }
 0x26d   :  { %384 = vsyncpa [#allocation3], 1 }
 0x26e   :  { %386 = vsyncpa [#allocation3 + $0x1], 1 }

</bundles_post_ra>
